<compile_context>
chip_gen: v7x
topology: tpu7x:2x2x1
jax: 0.10.0
libtpu: 0.0.40
codegen_flags: <defaults>
</compile_context>

<pallas_src>
import functools
import math

import jax
import jax.numpy as jnp
from jax.experimental import pallas as pl
from jax.experimental.pallas import tpu as pltpu


def _round_up(x, m):
    return ((x + m - 1) // m) * m


def _xlogx(x):
    # 0 * log(0) := 0  (KLDivLoss convention for t <= 0)
    return float(x) * math.log(x) if x > 0.0 else 0.0


def _label_smoothing_kernel(pred_ref, target_ref, out_ref, *,
                            n_rows, tile_rows, steps_per_partial,
                            confidence, smooth_val, w_sum):
    p = pl.program_id(0)          # partial (parallel) axis
    i = pl.program_id(1)          # streaming (arbitrary) axis

    # --- init this partial's resident output block ---
    @pl.when(i == 0)
    def _init():
        out_ref[...] = jnp.zeros_like(out_ref)

    pred = pred_ref[...].astype(jnp.float32)      # (TN, C) f32 in VMEM
    tgt = target_ref[...]                         # (TN, 1) int32

    # --- log-softmax pieces: one exp per element, one log per row ---
    m = jnp.max(pred, axis=-1, keepdims=True)                          # (TN, 1)
    shifted = pred - m                                                 # (TN, C)
    lse = jnp.log(jnp.sum(jnp.exp(shifted), axis=-1, keepdims=True))   # (TN, 1)

    # --- fused weighted row reduction ---
    #   -sum_c t_c * logp_c = -( sum_c t_c*shifted_c - lse * sum_c t_c )
    col = jax.lax.broadcasted_iota(jnp.int32, pred.shape, 1)
    w = jnp.where(col == tgt, confidence, smooth_val)                  # (TN, C)
    cross = -(jnp.sum(shifted * w, axis=-1, keepdims=True) - lse * w_sum)  # (TN,1)

    # --- mask tail-overhang rows and duplicate (clamped) trailing blocks ---
    blk = p * steps_per_partial + i
    row = jax.lax.broadcasted_iota(jnp.int32, (tile_rows, 1), 0) + blk * tile_rows
    cross = jnp.where(row < n_rows, cross, 0.0)

    # broadcast-accumulate the tile's partial sum into this partial's block
    out_ref[...] += jnp.sum(cross)


def label_smoothing_loss(pred, target, *, classes, smoothing=0.0,
                         row_tile=None, num_partials=2):
    """pred: (N, C) float logits (any float dtype), target: (N,) int labels
    -> scalar float32 loss matching nn.KLDivLoss()(log_softmax(pred), smoothed)."""
    N, C = pred.shape
    itemsize = jnp.dtype(pred.dtype).itemsize

    # Working set per tile row: double-buffered input + ~6 f32-width temporaries
    # (f32 upcast, shifted, exp, weights, product, iota).
    per_row_bytes = 2 * C * itemsize + 6 * C * 4
    if row_tile is None:
        budget = 20 * 1024 * 1024                      # multi-MiB blocks, no 1024 cap
        row_tile = max(8, budget // per_row_bytes)
    row_tile = max(8, (int(row_tile) // 8) * 8)
    row_tile = min(row_tile, _round_up(N, 8))

    n_blocks = pl.cdiv(N, row_tile)
    num_partials = max(1, min(int(num_partials), n_blocks))
    steps = pl.cdiv(n_blocks, num_partials)

    target2d = target.reshape(N, 1).astype(jnp.int32)

    # Compile-time constants (derived from the actual pred width C so the
    # semantics match the PyTorch module even when classes != C).
    confidence = 1.0 - float(smoothing)
    smooth_val = float(smoothing) / (classes - 1) if classes > 1 else 0.0
    w_sum = confidence + (C - 1) * smooth_val          # == 1.0 when classes == C
    entropy_total = float(N) * (_xlogx(confidence) + (C - 1) * _xlogx(smooth_val))
    inv_total = 1.0 / float(N * C)

    kernel = functools.partial(
        _label_smoothing_kernel,
        n_rows=int(N), tile_rows=int(row_tile), steps_per_partial=int(steps),
        confidence=confidence, smooth_val=smooth_val, w_sum=float(w_sum))

    def in_index_map(p, i, s=steps, nb=n_blocks):
        # Clamp so trailing (empty) grid steps re-read the last valid block;
        # the in-kernel row mask zeroes their contribution.
        return (jnp.minimum(p * s + i, nb - 1), 0)

    # VMEM limit: working set of one tile (double-buffered input + f32 temps)
    # plus headroom; stays within v7x's 64 MiB physical VMEM for default tiles.
    working_set = row_tile * per_row_bytes + num_partials * 8 * 128 * 4
    vmem_limit = int(max(32 * 1024 * 1024, min(96 * 1024 * 1024,
                                               2 * working_set + 4 * 1024 * 1024)))

    cost = pl.CostEstimate(
        flops=6 * N * C,
        transcendentals=N * C + 2 * N,                 # exp per elem, log per row
        bytes_accessed=N * C * itemsize + N * 4 + num_partials * 8 * 128 * 4)

    partials = pl.pallas_call(
        kernel,
        out_shape=jax.ShapeDtypeStruct((num_partials, 8, 128), jnp.float32),
        grid_spec=pltpu.PrefetchScalarGridSpec(
            num_scalar_prefetch=0,
            grid=(num_partials, steps),
            in_specs=[
                pl.BlockSpec((row_tile, C), in_index_map),
                pl.BlockSpec((row_tile, 1), in_index_map),
            ],
            # One resident (1,8,128) accumulator block per partial.
            out_specs=pl.BlockSpec((1, 8, 128), lambda p, i: (p, 0, 0)),
        ),
        compiler_params=pltpu.CompilerParams(
            dimension_semantics=("parallel", "arbitrary"),
            vmem_limit_bytes=vmem_limit),
        cost_estimate=cost,
    )(pred, target2d)

    # Finalize on the host side: sum per-partial accumulators, add the analytic
    # entropy constant, normalize by N*C (KLDivLoss default 'mean').
    return (jnp.sum(partials[:, 0, 0]) + entropy_total) * inv_total


def _reference_loss(pred, target, *, classes, smoothing):
    """Pure-JAX reference mirroring the PyTorch module (KLDivLoss, mean over all)."""
    logp = jax.nn.log_softmax(pred.astype(jnp.float32), axis=-1)
    confidence = 1.0 - smoothing
    smooth_val = smoothing / (classes - 1)
    true_dist = jnp.full_like(logp, smooth_val)
    true_dist = true_dist.at[jnp.arange(pred.shape[0]), target].set(confidence)
    pointwise = jnp.where(true_dist > 0,
                          true_dist * (jnp.log(jnp.maximum(true_dist, 1e-30)) - logp),
                          0.0)
    return jnp.mean(pointwise)


if __name__ == "__main__":
    N, C = 52, 128          # batch (deliberately not a multiple of the tile), classes
    SMOOTHING = 0.1

    key = jax.random.PRNGKey(0)
    k1, k2 = jax.random.split(key)
    pred = jax.random.normal(k1, (N, C), dtype=jnp.float32)
    target = jax.random.randint(k2, (N,), 0, C, dtype=jnp.int32)

    # Small row tile to exercise the grid / per-partial accumulators / tail mask.
    loss = label_smoothing_loss(pred, target, classes=C, smoothing=SMOOTHING,
                                row_tile=16, num_partials=2)
    loss = jax.block_until_ready(loss)
    ref = _reference_loss(pred, target, classes=C, smoothing=SMOOTHING)
    assert jnp.allclose(loss, ref, rtol=1e-4, atol=1e-6), (loss, ref)

    # Auto tile-size path + smoothing = 0 edge case (KLDivLoss zeros t <= 0 terms).
    loss0 = label_smoothing_loss(pred, target, classes=C, smoothing=0.0)
    loss0 = jax.block_until_ready(loss0)
    ref0 = _reference_loss(pred, target, classes=C, smoothing=0.0)
    assert jnp.allclose(loss0, ref0, rtol=1e-4, atol=1e-6), (loss0, ref0)

    print("KERNEL_OK")
</pallas_src>

<mosaic_0001>
module attributes {stable_mosaic.version = 11 : i64} {
  func.func @_label_smoothing_kernel(%arg0: i32, %arg1: i32, %arg2: memref<16x128xf32, #tpu.memory_space<vmem>>, %arg3: memref<16x1xi32, #tpu.memory_space<vmem>>, %arg4: memref<1x8x128xf32, #tpu.memory_space<vmem>>) attributes {dimension_semantics = [#tpu.dimension_semantics<parallel>, #tpu.dimension_semantics<arbitrary>], iteration_bounds = array<i64: 2, 2>, scalar_prefetch = 0 : i64, scratch_operands = 0 : i64, tpu.core_type = #tpu.core_type<tc>, window_params = [{transform_indices = @transform_0, window_bounds = array<i64: 16, 128>}, {transform_indices = @transform_1, window_bounds = array<i64: 16, 1>}, {transform_indices = @transform_2, window_bounds = array<i64: 1, 8, 128>}]} {
    %c0_i32 = arith.constant 0 : i32
    %0 = arith.cmpi eq, %arg1, %c0_i32 : i32
    %1 = arith.extui %0 : i1 to i32
    %c0_i32_0 = arith.constant 0 : i32
    %2 = arith.cmpi ne, %1, %c0_i32_0 : i32
    scf.if %2 {
      %cst_18 = arith.constant 0.000000e+00 : f32
      %45 = vector.broadcast %cst_18 : f32 to vector<1x8x128xf32>
      %c0_19 = arith.constant 0 : index
      %c0_20 = arith.constant 0 : index
      %c0_21 = arith.constant 0 : index
      %46 = vector.load %arg4[%c0_19, %c0_20, %c0_21] : memref<1x8x128xf32, #tpu.memory_space<vmem>>, vector<1x8x128xf32>
      tpu.vector_store %arg4[%c0_19, %c0_20, %c0_21], %45 {strides = array<i32>} : memref<1x8x128xf32, #tpu.memory_space<vmem>>, vector<1x8x128xf32>,
    } else {
    }
    %c0 = arith.constant 0 : index
    %c0_1 = arith.constant 0 : index
    %3 = vector.load %arg2[%c0, %c0_1] : memref<16x128xf32, #tpu.memory_space<vmem>>, vector<16x128xf32>
    %c0_2 = arith.constant 0 : index
    %c0_3 = arith.constant 0 : index
    %4 = vector.load %arg3[%c0_2, %c0_3] : memref<16x1xi32, #tpu.memory_space<vmem>>, vector<16x1xi32>
    %cst = arith.constant dense<0xFF800000> : vector<16xf32>
    %5 = vector.multi_reduction <maximumf>, %3, %cst [1] : vector<16x128xf32> to vector<16xf32>
    %6 = vector.shape_cast %5 : vector<16xf32> to vector<16x1xf32>
    %7 = vector.broadcast %6 : vector<16x1xf32> to vector<16x128xf32>
    %8 = arith.subf %3, %7 : vector<16x128xf32>
    %9 = math.exp %8 : vector<16x128xf32>
    %cst_4 = arith.constant dense<0.000000e+00> : vector<16xf32>
    %10 = vector.multi_reduction <add>, %9, %cst_4 [1] : vector<16x128xf32> to vector<16xf32>
    %11 = vector.shape_cast %10 : vector<16xf32> to vector<16x1xf32>
    %12 = math.log %11 : vector<16x1xf32>
    %13 = tpu.iota {dimensions = array<i32: 1>} : vector<16x128xi32>
    %14 = vector.broadcast %4 : vector<16x1xi32> to vector<16x128xi32>
    %15 = arith.cmpi eq, %13, %14 : vector<16x128xi32>
    %cst_5 = arith.constant 0.899999976 : f32
    %cst_6 = arith.constant 7.87401571E-4 : f32
    %16 = vector.broadcast %cst_5 : f32 to vector<16x128xf32>
    %17 = vector.broadcast %cst_6 : f32 to vector<16x128xf32>
    %18 = arith.select %15, %16, %17 : vector<16x128xi1>, vector<16x128xf32>
    %19 = arith.mulf %8, %18 : vector<16x128xf32>
    %cst_7 = arith.constant dense<0.000000e+00> : vector<16xf32>
    %20 = vector.multi_reduction <add>, %19, %cst_7 [1] : vector<16x128xf32> to vector<16xf32>
    %21 = vector.shape_cast %20 : vector<16xf32> to vector<16x1xf32>
    %cst_8 = arith.constant 1.000000e+00 : f32
    %22 = vector.broadcast %cst_8 : f32 to vector<16x1xf32>
    %23 = arith.mulf %12, %22 : vector<16x1xf32>
    %24 = arith.subf %21, %23 : vector<16x1xf32>
    %cst_9 = arith.constant 0.000000e+00 : f32
    %25 = vector.broadcast %cst_9 : f32 to vector<16x1xf32>
    %26 = arith.subf %25, %24 : vector<16x1xf32>
    %c2_i32 = arith.constant 2 : i32
    %27 = arith.muli %arg0, %c2_i32 : i32
    %28 = arith.addi %27, %arg1 : i32
    %29 = tpu.iota {dimensions = array<i32: 0>} : vector<16x1xi32>
    %c16_i32 = arith.constant 16 : i32
    %30 = arith.muli %28, %c16_i32 : i32
    %31 = vector.broadcast %30 : i32 to vector<16x1xi32>
    %32 = arith.addi %29, %31 : vector<16x1xi32>
    %c52_i32 = arith.constant 52 : i32
    %33 = vector.broadcast %c52_i32 : i32 to vector<16x1xi32>
    %34 = arith.cmpi slt, %32, %33 : vector<16x1xi32>
    %cst_10 = arith.constant 0.000000e+00 : f32
    %35 = vector.broadcast %cst_10 : f32 to vector<16x1xf32>
    %36 = arith.select %34, %26, %35 : vector<16x1xi1>, vector<16x1xf32>
    %c0_11 = arith.constant 0 : index
    %c0_12 = arith.constant 0 : index
    %c0_13 = arith.constant 0 : index
    %37 = vector.load %arg4[%c0_11, %c0_12, %c0_13] : memref<1x8x128xf32, #tpu.memory_space<vmem>>, vector<1x8x128xf32>
    %38 = vector.shape_cast %36 : vector<16x1xf32> to vector<1x16x1xf32>
    %cst_14 = arith.constant dense<0.000000e+00> : vector<1xf32>
    %39 = vector.multi_reduction <add>, %38, %cst_14 [1, 2] : vector<1x16x1xf32> to vector<1xf32>
    %40 = vector.shape_cast %39 : vector<1xf32> to vector<1x1x1xf32>
    %41 = vector.extract %40[0, 0, 0] : f32 from vector<1x1x1xf32>
    %42 = vector.broadcast %41 : f32 to vector<1x8x128xf32>
    %43 = arith.addf %37, %42 : vector<1x8x128xf32>
    %c0_15 = arith.constant 0 : index
    %c0_16 = arith.constant 0 : index
    %c0_17 = arith.constant 0 : index
    %44 = vector.load %arg4[%c0_15, %c0_16, %c0_17] : memref<1x8x128xf32, #tpu.memory_space<vmem>>, vector<1x8x128xf32>
    tpu.vector_store %arg4[%c0_15, %c0_16, %c0_17], %43 {strides = array<i32>} : memref<1x8x128xf32, #tpu.memory_space<vmem>>, vector<1x8x128xf32>,
    return
  }
  func.func @transform_0(%arg0: i32, %arg1: i32) -> (i32, i32) {
    %c2_i32 = arith.constant 2 : i32
    %0 = arith.muli %arg0, %c2_i32 : i32
    %1 = arith.addi %0, %arg1 : i32
    %c3_i32 = arith.constant 3 : i32
    %2 = arith.minsi %1, %c3_i32 : i32
    %c0_i32 = arith.constant 0 : i32
    %c0_i32_0 = arith.constant 0 : i32
    return %2, %c0_i32 : i32, i32
  }
  func.func @transform_1(%arg0: i32, %arg1: i32) -> (i32, i32) {
    %c2_i32 = arith.constant 2 : i32
    %0 = arith.muli %arg0, %c2_i32 : i32
    %1 = arith.addi %0, %arg1 : i32
    %c3_i32 = arith.constant 3 : i32
    %2 = arith.minsi %1, %c3_i32 : i32
    %c0_i32 = arith.constant 0 : i32
    %c0_i32_0 = arith.constant 0 : i32
    return %2, %c0_i32 : i32, i32
  }
  func.func @transform_2(%arg0: i32, %arg1: i32) -> (i32, i32, i32) {
    %c0_i32 = arith.constant 0 : i32
    %c0_i32_0 = arith.constant 0 : i32
    %c0_i32_1 = arith.constant 0 : i32
    return %arg0, %c0_i32, %c0_i32_0 : i32, i32, i32
  }
}

</mosaic_0001>

<bundles_post_ra>
// kernel: tpu_custom_call.1
= control target key start
LH: loop header
LB: loop body
LE: loop exit
PB: predicated region body
PF: predicated region fallthrough
CT: control target
= control target key end

     0   :  { %7 = vsyncpa [#allocation3], 0  ;;  %s824_s0 = inlined_call_operand.vmem [shape: f32[52,128], index: 0, kind: input, shape index: {}]   ;;  %s825_s1 = inlined_call_operand.vmem [shape: s32[52,1], index: 1, kind: input, shape index: {}]   ;;  %s826_s2 = inlined_call_operand.hbm [shape: f32[2,8,128], index: 2, kind: output, shape index: {}]  }
   0x1   :  { %9 = vsyncpa [#allocation3 + $0x1], 0  ;;  %s673_s9 = smov 0   ;;  %s675_s10 = smov 0  }
   0x2   :  { %s677_s11 = smov 0   ;;  %s679_s12 = smov 0  }
   0x3   :  { %s681_s13 = smov 0   ;;  %s683_s14 = smov 0  }
   0x4   :  { %s685_s15 = smov 0   ;;  %s687_s16 = smov 0  }
   0x5 LB: > { %s449_s17 = sadd.s32 4294967295, %s652_s16   ;;  %s450_s18 = sadd.s32 4294967294, %s652_s16   ;;  %s652_s16 = sphi %s687_s16, %s15_s16   ;;  %s648_s15 = sphi %s685_s15, %s835_s15   ;;  %s644_s14 = sphi %s683_s14, %s834_s14   ;;  %s640_s13 = sphi %s681_s13, %s833_s13   ;;  %s636_s12 = sphi %s679_s12, %s832_s12   ;;  %s632_s11 = sphi %s677_s11, %s831_s11   ;;  %s628_s10 = sphi %s675_s10, %s830_s10   ;;  %s624_s9 = sphi %s673_s9, %s829_s9  }
   0x6   : > { %s24_s19 = sadd.s32 1, %s644_s14  ;;  %s27_s20 = sadd.s32 1, %s648_s15 }
   0x7   : > { %p25_p0 = scmp.ge.s32.totalorder %s24_s19, 2  ;;  %p112_p1 = scmp.ne.s32.totalorder %s632_s11, %s628_s10 }
   0x8   : > { %p113_p2 = scmp.eq.s32.totalorder %s449_s17, 3  ;;  %p118_p4 = scmp.ne.s32.totalorder %s628_s10, %s624_s9 }
   0x9   : > { %s837_s19 = smov (%p25_p0, %s24_s19), 0  ;;  %s839_s20 = smov (!%p25_p0, %s27_s20), %s648_s15 }
   0xa   : > { %p722_p3 = por %p113_p2, %p112_p1  ;;  %p29_p5 = scmp.ge.s32.totalorder %s839_s20, 2 }
   0xb   : > { %p119_p6 = scmp.eq.s32.totalorder %s450_s18, 3  ;;  %p457_p7 = scmp.ge.s32.totalorder %s652_s16, 1 }
   0xc   : > { %p187_p8 = scmp.lt.s32.totalorder %s652_s16, 5  ;;  %s841_s20 = smov (%p29_p5, %s839_s20), 0 }
   0xd   : > { %p732_p9 = por %p119_p6, %p118_p4  ;;  %s99_s23 = ssub.s32 %s648_s15, %s841_s20 }
   0xe   : > { %p188_p10 = pnand %p457_p7, %p187_p8  ;;  %s102_s24 = sadd.s32 1, %s632_s11 }
   0xf   : > { %p100_p11 = scmp.eq.s32.totalorder %s99_s23, 0  ;;  %s227_s26 = sand.u32 (!%p188_p10), 1, %s628_s10  }
  0x10   : > { %191 = sbr.rel (%p188_p10) target bundleno = 577 (0x241), region = 28  ;;  %s459_s27 = sshll.u32 (!%p188_p10), %s640_s13, 1 }
  0x11   : > { %s740_s25 = scalar_select %p100_p11, %s632_s11, %s102_s24  }
  0x12   : > { %s458_s28 = sshll.u32 (!%p188_p10), %s227_s26, 3  ;;  %s747_s29 = sadd.s32 (!%p188_p10), %s636_s12, %s459_s27 }
  0x13   : > { %p232_p12 = scmp.lt.s32.totalorder (!%p188_p10), %s747_s29, 3  ;;  %s757_s23 = scalar_lea.vmem (!%p188_p10), [#allocation2], %s458_s28 }
  0x14   : > { %p465_p0 = scmp.ne.s32.totalorder (!%p188_p10), %s636_s12, 0 }
  0x17   : > { %s233_s30 = scalar_select %p232_p12, %s747_s29, 3 }
  0x18   : > { %277 = sbr.rel (%p465_p0) target bundleno = 31 (0x1f), region = 32  ;;  %v654_v0 = vmov (!%p465_p0), 0.0  }
  0x19   : > { %s460_s3 = sshll.u32 %s233_s30, 1  ;;  %278 = vst [vmem:[%s757_s23] sm:$0xff] (!%p465_p0), %v654_v0 }
  0x1a   : > { %p239_p13 = scmp.lt.s32.totalorder %s460_s3, 6 }
  0x1c   : > { %s843_s3 = smov (!%p239_p13, %s460_s3), 6 }
  0x1d   : > { %s461_s4 = sshll.u32 %s843_s3, 3 }
  0x1e   : > { %s242_s7 = scalar_lea.vmem %s824_s0, %s461_s4  ;;  %s264_s18 = scalar_lea.vmem %s825_s1, %s461_s4 }
  0x1f PF: > { %v279_v1 = vld [vmem:[%s242_s7] sm:$0xff]  ;;  %v655_v3 = vmov 0   ;;  %v280_v4 = vld [vmem:[%s242_s7 + $0x8] sm:$0xff]  ;;  %v301_v9 = vlaneseq  ;;  %v656_v17 = vmov 0.0007874016   ;;  %s467_s12 = sshll.u32 %s747_s29, 4 }
  0x20   : > { %v281_v2 = vld [vmem:[%s264_s18] sm:$0xff]  ;;  %283 = vmax.xlane.f32.xlu0 %v279_v1  ;;  %548 = vset.pattern.permute.xlu1 %v655_v3  ;;  %v282_v5 = vld [vmem:[%s264_s18 + $0x8] sm:$0xff]  ;;  %v329_v26 = vstv %s467_s12  ;;  %vm337_vm4 = vcmask 7168   ;;  %s469_s24 = sshll.u32 %s640_s13, 7  ;;  %s367_s27 = sshll.u32 %s757_s23, 4  ;;  %s770_s27 = int_to_ptr.vmem [resolvable:$true] %s367_s27 }
  0x21   : > { %304 = vperm.xlu1 %548, %v281_v2   ;;  %549 = vset.pattern.permute.xlu0 %v655_v3  ;;  %v302_v14 = vand.u32 127, %v301_v9  ;;  %v326_v25 = vshrl.u32 %v301_v9, 7  ;;  %v336_v52 = vld [vmem:[%s757_s23] sm:$0xff]  ;;  %s768_s3 = scalar_lea.hbm %s826_s2, %s469_s24  ;;  %s354_s4 = scalar_lea.sflag [#allocation3], %s227_s26 }
  0x22   : > { %s558_s5 = scalar_lea.vmem %s770_s27, 128  ;;  %s657_s13 = smov [#allocation2]  }
  0x23   : > { %v327_v29 = vadd.s32 8, %v326_v25  ;;  %v330_v31 = vadd.s32 %v329_v26, %v326_v25  ;;  %p559_p1 = scmp.ne.s32.totalorder %s770_s27, %s558_s5  ;;  %s562_s6 = sshll.u32 %s657_s13, 4  ;;  %s563_s6 = int_to_ptr.vmem [resolvable:$false] %s562_s6 }
  0x24   : > { %285 = vmax.xlane.f32.xlu0 %v280_v4  ;;  %s564_s7 = scalar_lea.vmem %s563_s6, 256  ;;  %p565_p5 = scmp.lt.s32.totalorder %s770_s27, %s563_s6 }
  0x25   : > { %307 = vperm.xlu1 %548, %v282_v5   ;;  %v331_v34 = vadd.s32 %v329_v26, %v327_v29  ;;  %vm332_vm2 = vcmp.lt.s32.totalorder %v330_v31, 52  ;;  %p560_p2 = pnand %p559_p1, %p722_p3  ;;  %p566_p6 = scmp.lt.s32.totalorder %s564_s7, %s558_s5 }
  0x27   : > { %vm333_vm3 = vcmp.lt.s32.totalorder %v331_v34, 52  ;;  %p561_p4 = pneg %p560_p2  ;;  %p567_p7 = por %p566_p6, %p565_p5 }
  0x29   : > { %p568_p8 = pnand %p567_p7, %p561_p4 }
  0xa0   : > { %v305_v12 = vpop.permute.xlu1 %304 }
  0xa1   : > { %vm309_vm0 = vcmp.eq.s32.totalorder %v302_v14, %v305_v12 }
  0xa2   : > { %v311_v18 = vsel %vm309_vm0, 0.9, %v656_v17 }
  0xa4   : > { %v308_v15 = vpop.permute.xlu1 %307 }
  0xa5   : > { %vm310_vm1 = vcmp.eq.s32.totalorder %v302_v14, %v308_v15 }
  0xa6   : > { %v312_v21 = vsel %vm310_vm1, 0.9, %v656_v17 }
  0xad   : > { %v284_v6 = vpop.xlane.xlu0 %283 }
  0xae   : > { %v287_v7 = vsub.f32 %v279_v1, %v284_v6 }
  0xb0   : > { %v289_v8 = vmul.f32 1.442695, %v287_v7  ;;  %v313_v19 = vmul.f32 %v311_v18, %v287_v7 }
  0xb1   : > { %v286_v10 = vpop.xlane.xlu0 %285 }
  0xb2   : > { %550 = vpow2.f32 %v289_v8  ;;  %v288_v11 = vsub.f32 %v280_v4, %v286_v10 }
  0xb4   : > { %v291_v13 = vmul.f32 1.442695, %v288_v11  ;;  %v314_v22 = vmul.f32 %v312_v21, %v288_v11 }
  0xb6   : > { %552 = vpow2.f32 %v291_v13 }
  0xbc   : > { %v551_v16 = vpop.eup %550 }
  0xbd   : > { %293 = vadd.xlane.f32.xlu0 %v551_v16 }
  0xc0   : > { %v553_v20 = vpop.eup %552 }
  0xc1   : > { %315 = vadd.xlane.f32.xlu0 %v313_v19  ;;  %295 = vadd.xlane.f32.xlu1 %v553_v20 }
  0xc5   : > { %317 = vadd.xlane.f32.xlu0 %v314_v22 }
 0x14a   : > { %v294_v23 = vpop.xlane.xlu0 %293 }
 0x14b   : > { %554 = vlog2.f32 %v294_v23 }
 0x14e   : > { %v296_v24 = vpop.xlane.xlu1 %295  ;;  %v316_v28 = vpop.xlane.xlu0 %315 }
 0x14f   : > { %556 = vlog2.f32 %v296_v24 }
 0x152   : > { %v318_v37 = vpop.xlane.xlu0 %317 }
 0x155   : > { %v555_v27 = vpop.eup %554 }
 0x156   : > { %v298_v30 = vmul.f32 0.6931472, %v555_v27 }
 0x158   : > { %v319_v32 = vsub.f32 %v316_v28, %v298_v30 }
 0x159   : > { %v557_v33 = vpop.eup %556 }
 0x15a   : > { %v321_v35 = vsub.f32 0.0, %v319_v32  ;;  %v300_v36 = vmul.f32 0.6931472, %v557_v33 }
 0x15c   : > { %v320_v38 = vsub.f32 %v318_v37, %v300_v36  ;;  %v334_v39 = vsel %vm332_vm2, %v321_v35, 0.0 }
 0x15d   : > { %v338_v42 = vsel %vm337_vm4, %v334_v39, 0.0 }
 0x15e   : > { %v322_v40 = vsub.f32 0.0, %v320_v38 }
 0x160   : > { %v335_v41 = vsel %vm333_vm3, %v322_v40, 0.0 }
 0x161   : > { %v339_v43 = vsel %vm337_vm4, %v335_v41, 0.0 }
 0x162   : > { %v340_v44 = vadd.f32 %v339_v43, %v338_v42 }
 0x164   : > { %341 = vadd.xlane.f32.xlu0 %v340_v44 }
 0x1f1   : > { %v342_v45 = vpop.xlane.xlu0 %341 }
 0x1f2   : > { %v343_v46 = vrot.slane %v342_v45, 4 }
 0x1f4   : > { %v344_v47 = vadd.f32 %v343_v46, %v342_v45 }
 0x1f6   : > { %v345_v48 = vrot.slane %v344_v47, 2 }
 0x1f8   : > { %v346_v49 = vadd.f32 %v345_v48, %v344_v47 }
 0x1fa   : > { %v347_v50 = vrot.slane %v346_v49, 1 }
 0x1fc   : > { %v348_v51 = vadd.f32 %v347_v50, %v346_v49 }
 0x1fe   : > { %472 = vpush %v348_v51 }
 0x22f   : > { %s473_s28 = spop %472 }
 0x230   : > { %v350_v53 = vstv %s473_s28 }
 0x231   : > { %v351_v54 = vadd.f32 %v350_v53, %v336_v52 }
 0x233   : > { %352 = vst [vmem:[%s757_s23] sm:$0xff] %v351_v54 }
 0x234   : > { %571 = shalt.err (!%p568_p8)
}
 0x235   : > { %s572_s26 = scalar_lea.hbm %s768_s3, 128  ;;  %s576_s18 = scalar_lea.hbm %s826_s2, 256 }
 0x236   : > { %p573_p10 = scmp.ne.s32.totalorder %s768_s3, %s572_s26  ;;  %p577_p13 = scmp.lt.u32.totalorder %s768_s3, %s826_s2 }
 0x237   : > { %p578_p0 = scmp.lt.u32.totalorder %s576_s18, %s572_s26  ;;  %p580_p2 = scmp.lt.u32.totalorder %s572_s26, %s768_s3 }
 0x238   : > { %p574_p11 = pnand %p573_p10, %p722_p3 }
 0x239   : > { %p579_p1 = por %p578_p0, %p577_p13 }
 0x23a   : > { %p575_p12 = pneg %p574_p11 }
 0x23b   : > { %p581_p4 = por %p580_p2, %p579_p1 }
 0x23d   : > { %p582_p5 = pnand %p581_p4, %p575_p12 }
 0x23f   : > { %585 = shalt.err (!%p582_p5)
}
 0x240   : > { %474 = dma.vmem_to_hbm [thread:$0]  (%p722_p3), %s770_s27, 128, %s768_s3, %s354_s4  }
 0x241 PF: > { %p480_p6 = scmp.ge.s32.totalorder %s652_s16, 2  ;;  %s379_s24 = sand.u32 1, %s624_s9  }
 0x242   : > { %s380_s28 = scalar_lea.sflag [#allocation3], %s379_s24 }
 0x243   : > { %p477_p7 = pnand %p480_p6, %p732_p9 }
 0x245   : > { %619 = dma.done.wait (!%p477_p7), %s380_s28, 128  }
 0x246   : > { %621 = vsyncadd (!%p477_p7), %s380_s28, 4294967168  ;;  %s15_s16 = sadd.s32 1, %s652_s16   ;;  %s829_s9 = smov %s628_s10 }
 0x247   : > { %p12_p8 = scmp.ge.s32.totalorder %s15_s16, 6   ;;  %s830_s10 = smov %s632_s11 }
 0x248   : > { %s831_s11 = smov %s740_s25  ;;  %s832_s12 = smov %s644_s14 }
 0x249   : > { %s833_s13 = smov %s648_s15  ;;  %s834_s14 = smov %s837_s19 }
 0x24a   : > { %s835_s15 = smov %s841_s20  ;;  %14 = sbr.rel (!%p12_p8) target bundleno = 5 (0x5), region = 70 }
 0x251   :  { %385 = vsyncpa [#allocation3], 1 }
 0x252   :  { %387 = vsyncpa [#allocation3 + $0x1], 1 }

</bundles_post_ra>
